<compile_context>
chip_gen: v7x
topology: tpu7x:2x2x1
jax: 0.10.0
libtpu: 0.0.40
codegen_flags: <defaults>
</compile_context>

<pallas_src>
import math
from functools import partial

import jax
import jax.numpy as jnp
from jax import lax
from jax.experimental import pallas as pl
from jax.experimental.pallas import tpu as pltpu

cfg = {'vgg16-3': [64, 64, 'M2', 128, 128, 'M2', 256, 256, 256, 'M2'],
       'vgg16-4': [512, 512, 512, 'M1'],
       'vgg16-5': ['D512', 'D512', 'D512', 'M1']}


# ---------------------------------------------------------------------------
# tiling helpers
# ---------------------------------------------------------------------------
def _round_up(x, m):
    return (x + m - 1) // m * m


def _row_tiling(m):
    """Row (M) padding/tile: multiple of 16 (bf16 sublane packing), tile capped at 512."""
    mp = _round_up(m, 16)
    if mp > 512:
        mp = _round_up(m, 128)
    for t in (512, 256, 128):
        if mp % t == 0:
            return t, mp
    return mp, mp


def _lane_tiling(d):
    """Lane (K/N) padding/tile: multiple of 128; prefer 512/256 (v6e/v7x MXU is 256 deep)."""
    dp = _round_up(d, 128)
    for t in (512, 256, 128):
        if dp % t == 0:
            return t, dp
    return 128, dp


def _tile_of(dp):
    """Recover the tile for an already-padded dimension."""
    for t in (512, 256, 128):
        if dp % t == 0:
            return t
    return dp


# ---------------------------------------------------------------------------
# Pallas tiled matmul kernel (hot path: every conv + fused classifier 1x1 convs)
# ---------------------------------------------------------------------------
def _matmul_kernel(a_ref, b_ref, bias_ref, o_ref, acc_ref, *, relu):
    @pl.when(pl.program_id(2) == 0)
    def _():
        acc_ref[...] = jnp.zeros_like(acc_ref)

    acc_ref[...] += jnp.dot(a_ref[...], b_ref[...],
                            preferred_element_type=jnp.float32)

    @pl.when(pl.program_id(2) == pl.num_programs(2) - 1)
    def _():
        out = acc_ref[...] + bias_ref[...]
        if relu:
            out = jnp.maximum(out, 0.0)
        o_ref[...] = out.astype(o_ref.dtype)


@partial(jax.jit, static_argnames=("relu",))
def matmul_padded(a_p, b_p, bias_p, relu=False):
    """out = (relu?)(a_p @ b_p + bias_p).

    a_p: (Mp, Kp) bf16, b_p: (Kp, Np) bf16 (both pre-padded to tile multiples),
    bias_p: (1, Np) f32.  Returns (Mp, Np) f32 (accumulation stays f32 on the MXU).
    """
    Mp, Kp = a_p.shape
    Kp2, Np = b_p.shape
    assert Kp == Kp2 and bias_p.shape == (1, Np)
    tm, tk, tn = _tile_of(Mp), _tile_of(Kp), _tile_of(Np)

    return pl.pallas_call(
        partial(_matmul_kernel, relu=relu),
        out_shape=jax.ShapeDtypeStruct((Mp, Np), jnp.float32),
        grid_spec=pltpu.PrefetchScalarGridSpec(
            num_scalar_prefetch=0,
            grid=(Mp // tm, Np // tn, Kp // tk),
            in_specs=[
                pl.BlockSpec((tm, tk), lambda i, j, k: (i, k)),
                pl.BlockSpec((tk, tn), lambda i, j, k: (k, j)),
                pl.BlockSpec((1, tn), lambda i, j, k: (0, j)),
            ],
            out_specs=pl.BlockSpec((tm, tn), lambda i, j, k: (i, j)),
            scratch_shapes=[pltpu.VMEM((tm, tn), jnp.float32)],
        ),
        compiler_params=pltpu.CompilerParams(
            dimension_semantics=("parallel", "parallel", "arbitrary"),
            vmem_limit_bytes=32 * 1024 * 1024),
    )(a_p, b_p, bias_p)


# ---------------------------------------------------------------------------
# Pallas batched correlation bmm (corr[g] = lhs[g] @ rhs[g]^T / c, no padding)
# ---------------------------------------------------------------------------
def _corr_kernel(l_ref, r_ref, o_ref, *, inv_c):
    # l_ref: (1, P, c) bf16, r_ref: (1, c, P) bf16, o_ref: (1, P, P) f32.
    prod = jnp.dot(l_ref[0], r_ref[0], preferred_element_type=jnp.float32)
    o_ref[...] = (prod * inv_c)[None]


@jax.jit
def pallas_corr(lhs, rhs):
    """lhs, rhs: (G, P, c) f32.  Returns (G, P, P) f32 with the 1/c scale folded in."""
    G, P, c = lhs.shape
    lhs_b = lhs.astype(jnp.bfloat16)
    rhs_t = jnp.swapaxes(rhs, 1, 2).astype(jnp.bfloat16)       # (G, c, P)
    return pl.pallas_call(
        partial(_corr_kernel, inv_c=1.0 / c),
        out_shape=jax.ShapeDtypeStruct((G, P, P), jnp.float32),
        grid=(G,),
        in_specs=[pl.BlockSpec((1, P, c), lambda g: (g, 0, 0)),
                  pl.BlockSpec((1, c, P), lambda g: (g, 0, 0))],
        out_specs=pl.BlockSpec((1, P, P), lambda g: (g, 0, 0)),
        compiler_params=pltpu.CompilerParams(
            dimension_semantics=("parallel",)),
    )(lhs_b, rhs_t)


# ---------------------------------------------------------------------------
# Conv / pooling / batchnorm helpers (conv hot path goes through matmul_padded)
# ---------------------------------------------------------------------------
@partial(jax.jit, static_argnames=("k", "dilation", "padding", "cout", "relu"))
def conv2d_nhwc(x, wmat, bias, *, k, dilation, padding, cout, relu):
    """NHWC conv via im2col + Pallas matmul.  wmat/bias are pre-padded (init-time)."""
    N, H, W, C = x.shape
    d, p = dilation, padding
    Hout = H + 2 * p - d * (k - 1)
    Wout = W + 2 * p - d * (k - 1)
    xp = jnp.pad(x, ((0, 0), (p, p), (p, p), (0, 0))).astype(jnp.bfloat16)
    # im2col in NHWC: channels stay the contiguous minor dim, no NCHW<->NHWC transposes.
    # TODO(synk): the 9x patch slab is still materialized (in bf16); streaming shifted
    # slabs straight from the padded activation needs element-offset BlockSpecs.
    taps = [xp[:, kh * d:kh * d + Hout, kw * d:kw * d + Wout, :]
            for kh in range(k) for kw in range(k)]
    patches = jnp.stack(taps, axis=3).reshape(N * Hout * Wout, k * k * C)
    M, Ktrue = patches.shape
    _, Mp = _row_tiling(M)
    _, Kp = _lane_tiling(Ktrue)
    assert Kp == wmat.shape[0], (Kp, wmat.shape)
    a = jnp.pad(patches, ((0, Mp - M), (0, Kp - Ktrue)))
    out = matmul_padded(a, wmat, bias, relu=relu)
    return out[:M, :cout].reshape(N, Hout, Wout, cout)


def maxpool_2x2_s2(x):       # 'M2'
    N, H, W, C = x.shape
    assert H % 2 == 0 and W % 2 == 0
    return x.reshape(N, H // 2, 2, W // 2, 2, C).max(axis=(2, 4))


def maxpool_3x3_s1_p1(x):    # 'M1'
    return lax.reduce_window(x, -jnp.inf, lax.max,
                             (1, 3, 3, 1), (1, 1, 1, 1),
                             ((0, 0), (1, 1), (1, 1), (0, 0)))


def batchnorm_nhwc(x, gamma, beta, eps=1e-5):
    # nn.BatchNorm2d forward in default (training) mode: biased batch statistics.
    mean = jnp.mean(x, axis=(0, 1, 2), keepdims=True)
    var = jnp.var(x, axis=(0, 1, 2), keepdims=True)
    return (x - mean) * lax.rsqrt(var + eps) * gamma + beta


# ---------------------------------------------------------------------------
# Parameter construction (deterministic; matmul-ready weights built once here)
# ---------------------------------------------------------------------------
def _init_conv(key, cin, cout, k):
    n = k * k * cout
    w = jax.random.normal(key, (k, k, cin, cout), jnp.float32) * math.sqrt(2.0 / n)
    return w, jnp.zeros((cout,), jnp.float32)


def _prep_conv(w, b):
    """(k,k,cin,cout) -> ((Kp,Np) bf16 matmul weight, (1,Np) f32 bias), padded once."""
    k, _, cin, cout = w.shape
    Ktrue = k * k * cin
    _, Kp = _lane_tiling(Ktrue)
    _, Np = _lane_tiling(cout)
    wmat = jnp.pad(w.reshape(Ktrue, cout), ((0, Kp - Ktrue), (0, Np - cout)))
    bias = jnp.pad(b, (0, Np - cout)).reshape(1, Np)
    return wmat.astype(jnp.bfloat16), bias.astype(jnp.float32)


def make_vgg_layers(key, cfg_list, in_channels):
    """make_layers equivalent: int -> 3x3 conv(pad=1)+ReLU, 'D###' -> 3x3 conv(dil=2,pad=2)
    +ReLU, 'M2' -> MaxPool(2,2), 'M1' -> MaxPool(3,1,pad=1)."""
    layers = []
    c = in_channels
    for v in cfg_list:
        if v in ('M2', 'M1'):
            layers.append((v, None))
        else:
            if isinstance(v, str) and v.startswith('D'):
                cout, dil, pad = int(v[1:]), 2, 2
            else:
                cout, dil, pad = int(v), 1, 1
            key, sub = jax.random.split(key)
            w, b = _init_conv(sub, c, cout, 3)
            wmat, bias = _prep_conv(w, b)
            layers.append(('conv', dict(wmat=wmat, bias=bias, cout=cout,
                                        dilation=dil, padding=pad)))
            c = cout
    return layers, key


def make_classifier(key, dilation_series, padding_series, inputscale, NoLabels):
    C2 = inputscale * 2                      # 96
    nb = len(dilation_series)
    branches, w1_blocks, b1_list, w2_blocks, b2_list = [], [], [], [], []
    for d, p in zip(dilation_series, padding_series):
        key, k0, k1, k2 = jax.random.split(key, 4)
        w0, b0 = _init_conv(k0, inputscale, C2, 3)
        w1, b1 = _init_conv(k1, C2, C2, 1)
        w2, b2 = _init_conv(k2, C2, NoLabels, 1)
        wmat0, bias0 = _prep_conv(w0, b0)
        branches.append(dict(wmat=wmat0, bias=bias0, cout=C2, dilation=d, padding=p))
        w1_blocks.append(w1.reshape(C2, C2))
        b1_list.append(b1)
        w2_blocks.append(w2.reshape(C2, NoLabels))
        b2_list.append(b2)
    Ctot = nb * C2                           # 384
    # Fused block-diagonal weight for the four per-branch 1x1 (96->96) convs: exact,
    # because off-diagonal blocks are zero and BN/ReLU act per channel.
    w1_bd = jnp.zeros((Ctot, Ctot), jnp.float32)
    for i, blk in enumerate(w1_blocks):
        w1_bd = w1_bd.at[i * C2:(i + 1) * C2, i * C2:(i + 1) * C2].set(blk)
    _, Kp = _lane_tiling(Ctot)
    _, Np = _lane_tiling(Ctot)
    w1_mat = jnp.pad(w1_bd, ((0, Kp - Ctot), (0, Np - Ctot))).astype(jnp.bfloat16)
    b1_mat = jnp.pad(jnp.concatenate(b1_list), (0, Np - Ctot)).reshape(1, Np)
    # Final 1x1 convs + branch sum == a single K-stacked (384, NoLabels) matmul.
    w2_stack = jnp.concatenate(w2_blocks, axis=0)
    b2_sum = jnp.sum(jnp.stack(b2_list), axis=0)
    return dict(branches=branches,
                g0=jnp.ones((Ctot,), jnp.float32), be0=jnp.zeros((Ctot,), jnp.float32),
                w1_mat=w1_mat, b1_mat=b1_mat.astype(jnp.float32),
                g1=jnp.ones((Ctot,), jnp.float32), be1=jnp.zeros((Ctot,), jnp.float32),
                w2=w2_stack, b2=b2_sum, ctot=Ctot, NoLabels=NoLabels), key


def init_dmac_params(key, NoLabels):
    s3, key = make_vgg_layers(key, cfg['vgg16-3'], 3)
    s4, key = make_vgg_layers(key, cfg['vgg16-4'], 256)
    s5, key = make_vgg_layers(key, cfg['vgg16-5'], 512)
    cls, key = make_classifier(key, [6, 12, 18, 24], [6, 12, 18, 24], 16 * 3, NoLabels)
    return dict(scale3=s3, scale4=s4, scale5=s5, classifier=cls)


# ---------------------------------------------------------------------------
# Forward pieces
# ---------------------------------------------------------------------------
def vgg_forward(x, layers):
    for kind, payload in layers:
        if kind == 'conv':
            x = conv2d_nhwc(x, payload['wmat'], payload['bias'], k=3,
                            dilation=payload['dilation'], padding=payload['padding'],
                            cout=payload['cout'], relu=True)
        elif kind == 'M2':
            x = maxpool_2x2_s2(x)
        else:  # 'M1'
            x = maxpool_3x3_s1_p1(x)
    return x


def get_mapping_indices(n_rows, n_cols):
    new_indices = []
    for r_x in range(n_rows):
        for c_x in range(n_cols):
            for r_b in range(n_rows):
                r_a = (r_b + r_x) % n_rows
                for c_b in range(n_cols):
                    c_a = (c_b + c_x) % n_cols
                    idx_a = r_a * n_cols + c_a
                    idx_b = r_b * n_cols + c_b
                    new_indices.append(idx_a * (n_rows * n_cols) + idx_b)
    return new_indices


def poolopt_on_corrmat(corr, select_indices):
    """corr: (G, P, h, w).  Plain jnp reductions: at (P,HW)=(16,16) a standalone Pallas
    launch is pure overhead (perf review), so only the bmm producing `corr` hits the MXU."""
    G, P, h, w = corr.shape
    max_corr = jnp.max(corr, axis=1, keepdims=True)
    avg_corr = jnp.mean(corr, axis=1, keepdims=True)
    value = jnp.sum(corr, axis=(2, 3))                 # (G, P) per-channel sums
    # TODO(synk): torch.sort(descending) has no clean Pallas equivalent; argsort stays in JAX.
    order = jnp.argsort(-value, axis=1)
    sel = jnp.take(order, select_indices, axis=1)      # (G, 6)
    idx = jnp.broadcast_to(sel[:, :, None, None], (G, sel.shape[1], h, w))
    sort_corr = jnp.take_along_axis(corr, idx, axis=1)
    return jnp.concatenate([max_corr, avg_corr, sort_corr], axis=1)   # (G, 8, h, w)


def corr_fun(x1, x2, new_indices, select_indices):
    """x1, x2: NHWC feature maps.  Returns (c1, c2) in NCHW with 16 channels each."""
    bs, h, w, c = x1.shape
    P = h * w
    a1 = x1.reshape(bs, P, c)
    a2 = x2.reshape(bs, P, c)
    # One batched Pallas bmm for the four pairings: corr12, corr21, corr11, corr22.
    lhs = jnp.concatenate([a2, a1, a1, a2], axis=0)
    rhs = jnp.concatenate([a1, a2, a1, a2], axis=0)
    corr = pallas_corr(lhs, rhs)                                     # (4*bs, P, P)
    corr = corr.reshape(4 * bs, P * P)[:, new_indices].reshape(4 * bs, P, h, w)
    pooled = poolopt_on_corrmat(corr, select_indices)                # (4*bs, 8, h, w)
    c12, c21 = pooled[0:bs], pooled[bs:2 * bs]
    c11, c22 = pooled[2 * bs:3 * bs], pooled[3 * bs:4 * bs]
    return jnp.concatenate([c12, c11], 1), jnp.concatenate([c21, c22], 1)


def classify_forward(cls, x):
    """x: (N, H, W, 48) NHWC.  Exactly matches the sum-of-branches Classify_Module."""
    # The four branch 3x3 convs keep separate im2cols/matmuls: their dilations
    # (6/12/18/24) differ, so a single fused Cout=384 conv would be incorrect.
    hs = [conv2d_nhwc(x, br['wmat'], br['bias'], k=3, dilation=br['dilation'],
                      padding=br['padding'], cout=br['cout'], relu=False)
          for br in cls['branches']]
    h = jnp.concatenate(hs, axis=-1)                                 # (N,H,W,384)
    h = jnp.maximum(batchnorm_nhwc(h, cls['g0'], cls['be0']), 0.0)

    N, H, W, Ctot = h.shape
    M = N * H * W
    _, Mp = _row_tiling(M)
    Kp, _ = cls['w1_mat'].shape
    a = jnp.pad(h.reshape(M, Ctot).astype(jnp.bfloat16), ((0, Mp - M), (0, Kp - Ctot)))
    h1 = matmul_padded(a, cls['w1_mat'], cls['b1_mat'], relu=False)[:M, :Ctot]
    h1 = jnp.maximum(batchnorm_nhwc(h1.reshape(N, H, W, Ctot), cls['g1'], cls['be1']), 0.0)

    # Final 1x1 convs (96 -> NoLabels) + branch sum as one K-stacked XLA dot; a 2-wide
    # Pallas matmul output would waste ~98% of the MXU tile (perf review).
    y = h1.reshape(M, Ctot) @ cls['w2'] + cls['b2']
    return y.reshape(N, H, W, cls['NoLabels'])


def dmac_forward(params, x1, x2, new_indices, select_indices):
    # NCHW module interface (PyTorch-compatible) -> NHWC internally, converted once.
    x1 = jnp.transpose(x1, (0, 2, 3, 1))
    x2 = jnp.transpose(x2, (0, 2, 3, 1))
    x1_3 = vgg_forward(x1, params['scale3'])
    x2_3 = vgg_forward(x2, params['scale3'])
    c1_3, c2_3 = corr_fun(x1_3, x2_3, new_indices, select_indices)
    x1_4 = vgg_forward(x1_3, params['scale4'])
    x2_4 = vgg_forward(x2_3, params['scale4'])
    c1_4, c2_4 = corr_fun(x1_4, x2_4, new_indices, select_indices)
    x1_5 = vgg_forward(x1_4, params['scale5'])
    x2_5 = vgg_forward(x2_4, params['scale5'])
    c1_5, c2_5 = corr_fun(x1_5, x2_5, new_indices, select_indices)
    c1 = jnp.concatenate([c1_3, c1_4, c1_5], 1)        # (bs, 48, h, w) NCHW
    c2 = jnp.concatenate([c2_3, c2_4, c2_5], 1)
    y1 = classify_forward(params['classifier'], jnp.transpose(c1, (0, 2, 3, 1)))
    y2 = classify_forward(params['classifier'], jnp.transpose(c2, (0, 2, 3, 1)))
    return jnp.transpose(y1, (0, 3, 1, 2)), jnp.transpose(y2, (0, 3, 1, 2))


# ---------------------------------------------------------------------------
if __name__ == "__main__":
    key = jax.random.PRNGKey(0)
    bs, Cin, H, W = 2, 3, 32, 32          # small inputs; Scale_3 downsamples by 8
    NoLabels = 2
    feat_h = feat_w = H // 8              # correlation operates on 4x4 feature maps

    kp, kx1, kx2 = jax.random.split(key, 3)
    params = init_dmac_params(kp, NoLabels)
    new_indices = jnp.asarray(get_mapping_indices(feat_h, feat_w), dtype=jnp.int32)
    select_indices = jnp.asarray([0, 1, 2, 3, 4, 5], dtype=jnp.int32)

    x1 = jax.random.normal(kx1, (bs, Cin, H, W), jnp.float32)
    x2 = jax.random.normal(kx2, (bs, Cin, H, W), jnp.float32)

    y1, y2 = dmac_forward(params, x1, x2, new_indices, select_indices)
    jax.block_until_ready((y1, y2))
    assert y1.shape == (bs, NoLabels, feat_h, feat_w)
    assert y2.shape == (bs, NoLabels, feat_h, feat_w)
    assert bool(jnp.all(jnp.isfinite(y1))) and bool(jnp.all(jnp.isfinite(y2)))
    print("KERNEL_OK")
</pallas_src>

<mosaic_0001>
module attributes {stable_mosaic.version = 11 : i64} {
  func.func @_matmul_kernel(%arg0: i32, %arg1: i32, %arg2: i32, %arg3: memref<512x128xbf16, #tpu.memory_space<vmem>>, %arg4: memref<128x128xbf16, #tpu.memory_space<vmem>>, %arg5: memref<1x128xf32, #tpu.memory_space<vmem>>, %arg6: memref<512x128xf32, #tpu.memory_space<vmem>>, %arg7: memref<512x128xf32, #tpu.memory_space<vmem>>) attributes {dimension_semantics = [#tpu.dimension_semantics<parallel>, #tpu.dimension_semantics<parallel>, #tpu.dimension_semantics<arbitrary>], iteration_bounds = array<i64: 4, 1, 1>, scalar_prefetch = 0 : i64, scratch_operands = 1 : i64, tpu.core_type = #tpu.core_type<tc>, window_params = [{transform_indices = @transform_0, window_bounds = array<i64: 512, 128>}, {transform_indices = @transform_1, window_bounds = array<i64: 128, 128>}, {transform_indices = @transform_2, window_bounds = array<i64: 1, 128>}, {transform_indices = @transform_3, window_bounds = array<i64: 512, 128>}]} {
    %c0_i32 = arith.constant 0 : i32
    %0 = arith.cmpi eq, %arg2, %c0_i32 : i32
    %1 = arith.extui %0 : i1 to i32
    %c0_i32_0 = arith.constant 0 : i32
    %2 = arith.cmpi ne, %1, %c0_i32_0 : i32
    scf.if %2 {
      %cst_10 = arith.constant 0.000000e+00 : f32
      %12 = vector.broadcast %cst_10 : f32 to vector<512x128xf32>
      %c0_11 = arith.constant 0 : index
      %c0_12 = arith.constant 0 : index
      %13 = vector.load %arg7[%c0_11, %c0_12] : memref<512x128xf32, #tpu.memory_space<vmem>>, vector<512x128xf32>
      tpu.vector_store %arg7[%c0_11, %c0_12], %12 {strides = array<i32>} : memref<512x128xf32, #tpu.memory_space<vmem>>, vector<512x128xf32>,
    } else {
    }
    %c0 = arith.constant 0 : index
    %c0_1 = arith.constant 0 : index
    %3 = vector.load %arg7[%c0, %c0_1] : memref<512x128xf32, #tpu.memory_space<vmem>>, vector<512x128xf32>
    %c0_2 = arith.constant 0 : index
    %c0_3 = arith.constant 0 : index
    %4 = vector.load %arg3[%c0_2, %c0_3] : memref<512x128xbf16, #tpu.memory_space<vmem>>, vector<512x128xbf16>
    %c0_4 = arith.constant 0 : index
    %c0_5 = arith.constant 0 : index
    %5 = vector.load %arg4[%c0_4, %c0_5] : memref<128x128xbf16, #tpu.memory_space<vmem>>, vector<128x128xbf16>
    %cst = arith.constant dense<0.000000e+00> : vector<512x128xf32>
    %6 = tpu.matmul %4, %5, %cst {dimension_numbers = #tpu.dot_dimension_numbers<[1], [0], [0], [1], [0, 0, 1, 1], [], []>} : vector<512x128xbf16>, vector<128x128xbf16>, vector<512x128xf32> -> vector<512x128xf32>
    %7 = arith.addf %3, %6 : vector<512x128xf32>
    %c0_6 = arith.constant 0 : index
    %c0_7 = arith.constant 0 : index
    %8 = vector.load %arg7[%c0_6, %c0_7] : memref<512x128xf32, #tpu.memory_space<vmem>>, vector<512x128xf32>
    tpu.vector_store %arg7[%c0_6, %c0_7], %7 {strides = array<i32>} : memref<512x128xf32, #tpu.memory_space<vmem>>, vector<512x128xf32>,
    %c0_i32_8 = arith.constant 0 : i32
    %9 = arith.cmpi eq, %arg2, %c0_i32_8 : i32
    %10 = arith.extui %9 : i1 to i32
    %c0_i32_9 = arith.constant 0 : i32
    %11 = arith.cmpi ne, %10, %c0_i32_9 : i32
    scf.if %11 {
      %c0_10 = arith.constant 0 : index
      %c0_11 = arith.constant 0 : index
      %12 = vector.load %arg7[%c0_10, %c0_11] : memref<512x128xf32, #tpu.memory_space<vmem>>, vector<512x128xf32>
      %c0_12 = arith.constant 0 : index
      %c0_13 = arith.constant 0 : index
      %13 = vector.load %arg5[%c0_12, %c0_13] : memref<1x128xf32, #tpu.memory_space<vmem>>, vector<1x128xf32>
      %14 = vector.broadcast %13 : vector<1x128xf32> to vector<512x128xf32>
      %15 = arith.addf %12, %14 : vector<512x128xf32>
      %cst_14 = arith.constant 0.000000e+00 : f32
      %16 = vector.broadcast %cst_14 : f32 to vector<512x128xf32>
      %17 = arith.maximumf %15, %16 : vector<512x128xf32>
      %c0_15 = arith.constant 0 : index
      %c0_16 = arith.constant 0 : index
      %18 = vector.load %arg6[%c0_15, %c0_16] : memref<512x128xf32, #tpu.memory_space<vmem>>, vector<512x128xf32>
      tpu.vector_store %arg6[%c0_15, %c0_16], %17 {strides = array<i32>} : memref<512x128xf32, #tpu.memory_space<vmem>>, vector<512x128xf32>,
    } else {
    }
    return
  }
  func.func @transform_0(%arg0: i32, %arg1: i32, %arg2: i32) -> (i32, i32) {
    %c0_i32 = arith.constant 0 : i32
    return %arg0, %arg2 : i32, i32
  }
  func.func @transform_1(%arg0: i32, %arg1: i32, %arg2: i32) -> (i32, i32) {
    %c0_i32 = arith.constant 0 : i32
    return %arg2, %arg1 : i32, i32
  }
  func.func @transform_2(%arg0: i32, %arg1: i32, %arg2: i32) -> (i32, i32) {
    %c0_i32 = arith.constant 0 : i32
    %c0_i32_0 = arith.constant 0 : i32
    return %c0_i32, %arg1 : i32, i32
  }
  func.func @transform_3(%arg0: i32, %arg1: i32, %arg2: i32) -> (i32, i32) {
    %c0_i32 = arith.constant 0 : i32
    return %arg0, %arg1 : i32, i32
  }
}

</mosaic_0001>

<bundles_post_ra>
// kernel: matmul_padded.1
= control target key start
LH: loop header
LB: loop body
LE: loop exit
PB: predicated region body
PF: predicated region fallthrough
CT: control target
= control target key end

     0   :  { %8 = vsyncpa [#allocation4], 0  ;;  %s2402_s0 = inlined_call_operand.hbm [shape: bf16[2048,128], index: 0, kind: input, shape index: {}]   ;;  %s2403_s1 = inlined_call_operand.hbm [shape: bf16[128,128], index: 1, kind: input, shape index: {}]   ;;  %s2404_s2 = inlined_call_operand.vmem [shape: f32[1,128], index: 2, kind: input, shape index: {}]   ;;  %s2405_s3 = inlined_call_operand.hbm [shape: f32[2048,128], index: 3, kind: output, shape index: {}]  }
   0x1   :  { %10 = vsyncpa [#allocation4 + $0x1], 0 }
   0x2   :  { %11 = vsyncpa [#allocation7], 0 }
   0x3   :  { %12 = vsyncpa [#allocation5], 0 }
   0x4   :  { %14 = vsyncpa [#allocation5 + $0x1], 0  ;;  %s2008_s12 = smov 0   ;;  %s2010_s13 = smov 0  }
   0x5   :  { %s2012_s14 = smov 0   ;;  %s2014_s15 = smov 0  }
   0x6   :  { %s2016_s16 = smov 0   ;;  %s2018_s17 = smov 0  }
   0x7 LB: > { %s1521_s18 = sadd.s32 4294967295, %s1979_s17   ;;  %s1522_s19 = sadd.s32 4294967294, %s1979_s17   ;;  %s1979_s17 = sphi %s2018_s17, %s20_s17   ;;  %s1975_s16 = sphi %s2016_s16, %s2428_s16   ;;  %s1971_s15 = sphi %s2014_s15, %s2427_s15   ;;  %s1967_s14 = sphi %s2012_s14, %s2426_s14   ;;  %s1963_s13 = sphi %s2010_s13, %s2425_s13   ;;  %s1959_s12 = sphi %s2008_s12, %s2424_s12  }
   0x8   : > { %p61_p0 = scmp.ne.s32.totalorder %s1963_s13, %s1959_s12  ;;  %p2042_p1 = scmp.eq.s32.totalorder %s1521_s18, 0 }
   0x9   : > { %p2046_p2 = scmp.eq.s32.totalorder %s1521_s18, 3  ;;  %p147_p3 = scmp.eq.s32.totalorder %s1522_s19, 3 }
   0xa   : > { %s2410_s20 = scalar_select %p2042_p1, 1, 0 }
   0xb   : > { %s2411_s21 = scalar_select %p2046_p2, 1, 0 }
   0xc   : > { %p2052_p4 = por %p2042_p1, %p61_p0  ;;  %p1523_p5 = scmp.ge.s32.totalorder %s1979_s17, 1 }
   0xd   : > { %p2057_p6 = por %p147_p3, %p61_p0  ;;  %p154_p7 = scmp.lt.s32.totalorder %s1979_s17, 5 }
   0xe   : > { %s2412_s22 = scalar_select %p2052_p4, 1, 0 }
   0xf   : > { %s2413_s23 = scalar_select %p2057_p6, 1, 0 }
  0x10   : > { %p2062_p8 = pnand %p1523_p5, %p154_p7  ;;  %s1981_s25 = smov [#allocation6]  }
  0x11   : > { %s170_s26 = sshll.u32 %s1981_s25, 4  ;;  %s39_s28 = sadd.s32 1, %s1975_s16  ;;  %s171_s26 = int_to_ptr.vmem [resolvable:$true] %s170_s26 }
  0x12   : > { %s2414_s24 = scalar_select %p2062_p8, 1, 0 }
  0x13   : > { %p1726_p9 = pneg %p2062_p8  ;;  %s1835_s4 = scalar_lea.hbm %s2403_s1, 1024 }
  0x14   : > { %p1836_p11 = scmp.ne.s32.totalorder %s2403_s1, %s1835_s4  ;;  %p1842_p3 = scmp.lt.u32.totalorder %s1835_s4, %s2403_s1 }
  0x15   : > { %p2070_p10 = pnand %p1726_p9, %p2042_p1 }
  0x17   : > { %p1837_p12 = pneg %p2070_p10 }
  0x19   : > { %p1838_p13 = pnand %p1837_p12, %p1836_p11 }
  0x1b   : > { %p1839_p0 = pneg %p1838_p13 }
  0x1d   : > { %p1844_p5 = pnand %p1842_p3, %p1839_p0 }
  0x1f   : > { %1847 = shalt.err (!%p1844_p5)
}
  0x20   : > { %s1848_s9 = scalar_lea.vmem %s171_s26, 1024  ;;  %p1856_p1 = scmp.lt.s32.totalorder %s171_s26, %s171_s26 }
  0x21   : > { %p1849_p7 = scmp.ne.s32.totalorder %s171_s26, %s1848_s9  ;;  %p1857_p4 = scmp.lt.s32.totalorder %s1848_s9, %s1848_s9 }
  0x23   : > { %p1851_p9 = pnand %p1849_p7, %p1837_p12  ;;  %p1858_p8 = por %p1857_p4, %p1856_p1 }
  0x25   : > { %p1852_p6 = pneg %p1851_p9 }
  0x27   : > { %p1859_p2 = pnand %p1858_p8, %p1852_p6 }
  0x29   : > { %1862 = shalt.err (!%p1859_p2)
}
  0x2a   : > { %s1982_s10 = smov 64   ;;  %s1983_s11 = smov 4  }
  0x2b   : > { %1729 = dma.hbm_to_vmem [thread:$0]  (!%p2070_p10), %s2403_s1, 1024, %s171_s26, [#allocation7], %s1982_s10, %s1982_s10, %s1983_s11  }
  0x2c   : > { %p41_p1 = scmp.ge.s32.totalorder %s39_s28, 4  ;;  %s48_s25 = sadd.s32 1, %s1967_s14 }
  0x2d   : > { %p55_p2 = scmp.ne.s32.totalorder %s1967_s14, %s1963_s13  ;;  %p56_p4 = scmp.eq.s32.totalorder %s1979_s17, 0 }
  0x2e   : > { %s2430_s28 = smov (%p41_p1, %s39_s28), 0  ;;  %p2417_p8 = scmp.ne.s32.totalorder %s2411_s21, 0 }
  0x2f   : > { %p2100_p6 = por %p56_p4, %p55_p2  ;;  %s43_s30 = ssub.s32 %s1975_s16, %s2430_s28 }
  0x30   : > { %p2106_p11 = por %p2417_p8, %p55_p2  ;;  %p1739_p12 = scmp.lt.s32.totalorder %s1979_s17, 4 }
  0x31   : > { %p46_p10 = scmp.eq.s32.totalorder %s43_s30, 0  ;;  %s190_s26 = sand.u32 1, %s1967_s14  }
  0x32   : > { %s1527_s4 = sshll.u32 %s190_s26, 8  ;;  %s1580_s6 = sshll.u32 %s1975_s16, 12 }
  0x33   : > { %s2115_s5 = scalar_select %p46_p10, %s1967_s14, %s48_s25  }
  0x34   : > { %s2121_s9 = scalar_lea.hbm %s2402_s0, %s1580_s6  ;;  %s194_s21 = scalar_lea.vmem [#allocation3], %s1527_s4 }
  0x35   : > { %s202_s18 = sshll.u32 %s194_s21, 4  ;;  %p2127_p13 = pnand %p1739_p12, %p2100_p6  ;;  %s2123_s18 = int_to_ptr.vmem [resolvable:$true] %s202_s18 }
  0x36   : > { %s2131_s25 = scalar_lea.sflag [#allocation4], %s190_s26  ;;  %s1863_s30 = scalar_lea.hbm %s2121_s9, 4096 }
  0x37   : > { %p1864_p0 = scmp.ne.s32.totalorder %s2121_s9, %s1863_s30  ;;  %p1865_p3 = pneg %p2127_p13 }
  0x38   : > { %s1868_s29 = scalar_lea.hbm %s2402_s0, 16384  ;;  %p1869_p9 = scmp.lt.u32.totalorder %s2121_s9, %s2402_s0 }
  0x39   : > { %p1866_p5 = pnand %p1865_p3, %p1864_p0  ;;  %p1870_p1 = scmp.lt.u32.totalorder %s1868_s29, %s1863_s30 }
  0x3a   : > { %p1872_p4 = scmp.lt.u32.totalorder %s1863_s30, %s2121_s9 }
  0x3b   : > { %p1867_p7 = pneg %p1866_p5  ;;  %p1871_p2 = por %p1870_p1, %p1869_p9 }
  0x3d   : > { %p1873_p6 = por %p1872_p4, %p1871_p2 }
  0x3f   : > { %p1874_p8 = pnand %p1873_p6, %p1867_p7 }
  0x41   : > { %1877 = shalt.err (!%p1874_p8)
}
  0x42   : > { %s1878_s26 = scalar_lea.vmem %s2123_s18, 4096  ;;  %s1984_s21 = smov [#allocation3]  }
  0x43   : > { %p1879_p12 = scmp.ne.s32.totalorder %s2123_s18, %s1878_s26  ;;  %s1883_s4 = sshll.u32 %s1984_s21, 4  ;;  %s1884_s4 = int_to_ptr.vmem [resolvable:$false] %s1883_s4 }
  0x44   : > { %s1885_s6 = scalar_lea.vmem %s1884_s4, 8192  ;;  %p1886_p5 = scmp.lt.s32.totalorder %s2123_s18, %s1884_s4 }
  0x45   : > { %p1881_p10 = pnand %p1879_p12, %p1865_p3  ;;  %p1887_p9 = scmp.lt.s32.totalorder %s1885_s6, %s1878_s26 }
  0x47   : > { %p1882_p0 = pneg %p1881_p10  ;;  %p1888_p1 = por %p1887_p9, %p1886_p5 }
  0x49   : > { %p1889_p2 = pnand %p1888_p1, %p1882_p0 }
  0x4b   : > { %1892 = shalt.err (!%p1889_p2)
}
  0x4c   : > { %1733 = dma.hbm_to_vmem [thread:$0]  (!%p2127_p13), %s2121_s9, 4096, %s2123_s18, %s2131_s25, %s1982_s10, %s1982_s10, %s1983_s11  }
  0x4d   : > { %p2420_p3 = scmp.ne.s32.totalorder %s2414_s24, 0 }
  0x4e   : > { %s2165_s30 = sand.u32 (!%p2420_p3), 1, %s1963_s13   ;;  %p2421_p7 = scmp.ne.s32.totalorder (!%p2420_p3), %s2412_s22, 0 }
  0x4f   : > { %214 = sbr.rel (%p2420_p3) target bundleno = 413 (0x19d), region = 32  ;;  %s1531_s29 = sshll.u32 (!%p2420_p3), %s2165_s30, 8 }
  0x50   : > { %s217_s7 = scalar_lea.sflag (!%p2420_p3), [#allocation4], %s2165_s30  ;;  %s2169_s8 = scalar_lea.vmem (!%p2420_p3), [#allocation3], %s1531_s29 }
  0x56   : > { %1946 = dma.done.wait (%p2421_p7), %s217_s7, 4096  }
  0x57   : > { %1948 = vsyncadd (%p2421_p7), %s217_s7, 4294963200  ;;  %p2422_p13 = scmp.ne.s32.totalorder %s2410_s20, 0 }
  0x59   : > { %1950 = dma.done.wait (%p2422_p13), [#allocation7], 1024  }
  0x5a   : > { %1952 = vsyncadd (%p2422_p13), [#allocation7], 4294966272  ;;  %v1795_v0 = vld [vmem:[#allocation6] sm:$0xff]   ;;  %v1796_v1 = vld [vmem:[#allocation6 + $0x8] sm:$0xff]   ;;  %s1533_s24 = sshll.u32 %s2165_s30, 9  ;;  %s1581_s11 = sshll.u32 %s1971_s15, 13 }
  0x5b   : > { %1622 = vmatprep.subr.bf16.mxu0 %v1795_v0  ;;  %1702 = vmatprep.subr.bf16.mxu1 %v1795_v0  ;;  %v1797_v2 = vld [vmem:[#allocation6 + $0x10] sm:$0xff]   ;;  %v1798_v3 = vld [vmem:[#allocation6 + $0x18] sm:$0xff]   ;;  %v1803_v4 = vld [vmem:[%s2169_s8] sm:$0xff]   ;;  %s2225_s10 = scalar_lea.vmem [#allocation8], %s1533_s24  ;;  %s2346_s19 = scalar_lea.hbm %s2405_s3, %s1581_s11 }
  0x5c   : > { %1623 = vmatpush3.bf16.msra.mxu0 %v1795_v0  ;;  %1710 = vmatpush3.bf16.msra.mxu1 %v1795_v0  ;;  %v1804_v5 = vld [vmem:[%s2169_s8 + $0x80] sm:$0xff]   ;;  %v1800_v7 = vld [vmem:[#allocation6 + $0x28] sm:$0xff]   ;;  %v1801_v8 = vld [vmem:[#allocation6 + $0x30] sm:$0xff]   ;;  %s1407_s9 = sshll.u32 %s2225_s10, 4  ;;  %s1393_s25 = scalar_lea.sflag [#allocation5], %s2165_s30  ;;  %s2348_s9 = int_to_ptr.vmem [resolvable:$true] %s1407_s9 }
  0x5d   : > { %1624 = vmatprep.subr.bf16.mxu0 %v1796_v1  ;;  %1703 = vmatprep.subr.bf16.mxu1 %v1796_v1  ;;  %v1799_v6 = vld [vmem:[#allocation6 + $0x20] sm:$0xff]   ;;  %v1802_v9 = vld [vmem:[#allocation6 + $0x38] sm:$0xff]   ;;  %v1805_v10 = vld [vmem:[%s2169_s8 + $0x8] sm:$0xff]   ;;  %s1893_s26 = scalar_lea.vmem %s2348_s9, 8192  ;;  %s1985_s21 = smov [#allocation8]  }
  0x5e   : > { %1638 = vmatprep.mubr.bf16.mxu0 %v1803_v4  ;;  %1670 = vmatprep.mubr.bf16.mxu1 %v1804_v5  ;;  %v1806_v11 = vld [vmem:[%s2169_s8 + $0x88] sm:$0xff]   ;;  %v1807_v12 = vld [vmem:[%s2169_s8 + $0x10] sm:$0xff]   ;;  %v1809_v14 = vld [vmem:[%s2169_s8 + $0x18] sm:$0xff]   ;;  %p1894_p4 = scmp.ne.s32.totalorder %s2348_s9, %s1893_s26  ;;  %s1897_s4 = sshll.u32 %s1985_s21, 4  ;;  %s1898_s4 = int_to_ptr.vmem [resolvable:$false] %s1897_s4 }
  0x5f   : > { %v1808_v13 = vld [vmem:[%s2169_s8 + $0x90] sm:$0xff]   ;;  %v1810_v15 = vld [vmem:[%s2169_s8 + $0x98] sm:$0xff]   ;;  %v1811_v16 = vld [vmem:[%s2169_s8 + $0x20] sm:$0xff]   ;;  %s1899_s6 = scalar_lea.vmem %s1898_s4, 16384  ;;  %p1900_p12 = scmp.lt.s32.totalorder %s2348_s9, %s1898_s4 }
  0x60   : > { %1625 = vmatpush3.bf16.msra.mxu0 %v1796_v1  ;;  %1711 = vmatpush3.bf16.msra.mxu1 %v1796_v1  ;;  %v1812_v17 = vld [vmem:[%s2169_s8 + $0xa0] sm:$0xff]   ;;  %v1813_v18 = vld [vmem:[%s2169_s8 + $0x28] sm:$0xff]   ;;  %v1815_v20 = vld [vmem:[%s2169_s8 + $0x30] sm:$0xff]   ;;  %p1895_p6 = pnand %p1894_p4, %p2106_p11  ;;  %p1901_p10 = scmp.lt.s32.totalorder %s1899_s6, %s1893_s26 }
  0x61   : > { %1626 = vmatprep.subr.bf16.mxu0 %v1797_v2  ;;  %1704 = vmatprep.subr.bf16.mxu1 %v1797_v2  ;;  %v1814_v19 = vld [vmem:[%s2169_s8 + $0xa8] sm:$0xff]   ;;  %v1816_v21 = vld [vmem:[%s2169_s8 + $0xb0] sm:$0xff]   ;;  %v1817_v22 = vld [vmem:[%s2169_s8 + $0x38] sm:$0xff]  }
  0x62   : > { %v1818_v23 = vld [vmem:[%s2169_s8 + $0xb8] sm:$0xff]   ;;  %v1819_v24 = vld [vmem:[%s2169_s8 + $0x40] sm:$0xff]   ;;  %v1821_v26 = vld [vmem:[%s2169_s8 + $0x48] sm:$0xff]   ;;  %p1896_p8 = pneg %p1895_p6  ;;  %p1902_p0 = por %p1901_p10, %p1900_p12 }
  0x63   : > { %v1820_v25 = vld [vmem:[%s2169_s8 + $0xc0] sm:$0xff]   ;;  %v1822_v27 = vld [vmem:[%s2169_s8 + $0xc8] sm:$0xff]   ;;  %v1823_v28 = vld [vmem:[%s2169_s8 + $0x50] sm:$0xff]  }
  0x64   : > { %1627 = vmatpush3.bf16.msra.mxu0 %v1797_v2  ;;  %1712 = vmatpush3.bf16.msra.mxu1 %v1797_v2  ;;  %v1824_v29 = vld [vmem:[%s2169_s8 + $0xd0] sm:$0xff]   ;;  %v1825_v30 = vld [vmem:[%s2169_s8 + $0x58] sm:$0xff]   ;;  %v1827_v32 = vld [vmem:[%s2169_s8 + $0x60] sm:$0xff]   ;;  %p1903_p5 = pnand %p1902_p0, %p1896_p8 }
  0x65   : > { %1628 = vmatprep.subr.bf16.mxu0 %v1798_v3  ;;  %1705 = vmatprep.subr.bf16.mxu1 %v1798_v3  ;;  %v1826_v31 = vld [vmem:[%s2169_s8 + $0xd8] sm:$0xff]   ;;  %v1828_v33 = vld [vmem:[%s2169_s8 + $0xe0] sm:$0xff]   ;;  %v1829_v34 = vld [vmem:[%s2169_s8 + $0x68] sm:$0xff]  }
  0x66   : > { %v1830_v35 = vld [vmem:[%s2169_s8 + $0xe8] sm:$0xff]   ;;  %v1831_v36 = vld [vmem:[%s2169_s8 + $0x70] sm:$0xff]   ;;  %v1833_v38 = vld [vmem:[%s2169_s8 + $0x78] sm:$0xff]  }
  0x67   : > { %v1832_v37 = vld [vmem:[%s2169_s8 + $0xf0] sm:$0xff]   ;;  %v1834_v39 = vld [vmem:[%s2169_s8 + $0xf8] sm:$0xff]   ;;  %v2214_v40 = vld [vmem:[%s2404_s2] ss:$0 sm:$0xff] }
  0x68   : > { %1629 = vmatpush3.bf16.msra.mxu0 %v1798_v3  ;;  %1713 = vmatpush3.bf16.msra.mxu1 %v1798_v3 }
  0x69   : > { %1630 = vmatprep.subr.bf16.mxu0 %v1799_v6  ;;  %1706 = vmatprep.subr.bf16.mxu1 %v1799_v6 }
  0x6c   : > { %1631 = vmatpush3.bf16.msra.mxu0 %v1799_v6  ;;  %1714 = vmatpush3.bf16.msra.mxu1 %v1799_v6 }
  0x6d   : > { %1632 = vmatprep.subr.bf16.mxu0 %v1800_v7  ;;  %1707 = vmatprep.subr.bf16.mxu1 %v1800_v7 }
  0x70   : > { %1633 = vmatpush3.bf16.msra.mxu0 %v1800_v7  ;;  %1715 = vmatpush3.bf16.msra.mxu1 %v1800_v7 }
  0x71   : > { %1634 = vmatprep.subr.bf16.mxu0 %v1801_v8  ;;  %1708 = vmatprep.subr.bf16.mxu1 %v1801_v8 }
  0x74   : > { %1635 = vmatpush3.bf16.msra.mxu0 %v1801_v8  ;;  %1716 = vmatpush3.bf16.msra.mxu1 %v1801_v8 }
  0x75   : > { %1636 = vmatprep.subr.bf16.mxu0 %v1802_v9  ;;  %1709 = vmatprep.subr.bf16.mxu1 %v1802_v9 }
  0x78   : > { %1637 = vmatpush3.bf16.msra.mxu0 %v1802_v9  ;;  %1717 = vmatpush3.bf16.msra.mxu1 %v1802_v9 }
  0x7b   : > { %1639 = vmatmul.mubr.bf16.vlgmr.msra.gmra.mrb[0].mxu0 %v1805_v10  ;;  %1671 = vmatmul.mubr.bf16.vlgmr.msra.gmra.mrb[0].mxu1 %v1806_v11 }
  0x7c   : > { %1642 = vmatprep.mubr.bf16.mxu0 %v1807_v12  ;;  %1674 = vmatprep.mubr.bf16.mxu1 %v1808_v13 }
  0x83   : > { %1643 = vmatmul.mubr.bf16.gmra.mrb[4].mxu0 %v1809_v14  ;;  %1675 = vmatmul.mubr.bf16.gmra.mrb[4].mxu1 %v1810_v15 }
  0x84   : > { %1646 = vmatprep.mubr.bf16.mxu0 %v1811_v16  ;;  %1678 = vmatprep.mubr.bf16.mxu1 %v1812_v17 }
  0x8b   : > { %1647 = vmatmul.mubr.bf16.gmra.mrb[8].mxu0 %v1813_v18  ;;  %1679 = vmatmul.mubr.bf16.gmra.mrb[8].mxu1 %v1814_v19 }
  0x8c   : > { %1650 = vmatprep.mubr.bf16.mxu0 %v1815_v20  ;;  %1682 = vmatprep.mubr.bf16.mxu1 %v1816_v21 }
  0x93   : > { %1651 = vmatmul.mubr.bf16.gmra.mrb[12].mxu0 %v1817_v22  ;;  %1683 = vmatmul.mubr.bf16.gmra.mrb[12].mxu1 %v1818_v23 }
  0x94   : > { %1654 = vmatprep.mubr.bf16.mxu0 %v1819_v24  ;;  %1686 = vmatprep.mubr.bf16.mxu1 %v1820_v25 }
  0x9b   : > { %1655 = vmatmul.mubr.bf16.gmra.mrb[16].mxu0 %v1821_v26  ;;  %1687 = vmatmul.mubr.bf16.gmra.mrb[16].mxu1 %v1822_v27 }
  0x9c   : > { %1658 = vmatprep.mubr.bf16.mxu0 %v1823_v28  ;;  %1690 = vmatprep.mubr.bf16.mxu1 %v1824_v29 }
  0xa3   : > { %1659 = vmatmul.mubr.bf16.gmra.mrb[20].mxu0 %v1825_v30  ;;  %1691 = vmatmul.mubr.bf16.gmra.mrb[20].mxu1 %v1826_v31 }
  0xa4   : > { %1662 = vmatprep.mubr.bf16.mxu0 %v1827_v32  ;;  %1694 = vmatprep.mubr.bf16.mxu1 %v1828_v33 }
  0xab   : > { %1663 = vmatmul.mubr.bf16.gmra.mrb[24].mxu0 %v1829_v34  ;;  %1695 = vmatmul.mubr.bf16.gmra.mrb[24].mxu1 %v1830_v35 }
  0xac   : > { %1666 = vmatprep.mubr.bf16.mxu0 %v1831_v36  ;;  %1698 = vmatprep.mubr.bf16.mxu1 %v1832_v37 }
  0xb3   : > { %1667 = vmatmul.mubr.bf16.gmra.mrb[28].mxu0 %v1833_v38  ;;  %1699 = vmatmul.mubr.bf16.gmra.mrb[28].mxu1 %v1834_v39 }
 0x14e   : > { %v1640_v41 = vpop.f32.mrb[0].mxu0  ;;  %v1672_v42 = vpop.f32.mrb[0].mxu1 }
 0x14f   : > { %v1202_v43 = vadd.f32 %v1640_v41, %v2214_v40  ;;  %v1234_v44 = vadd.f32 %v1672_v42, %v2214_v40  ;;  %v743_v45 = vpop.f32.mrb[1].mxu0  ;;  %v871_v46 = vpop.f32.mrb[1].mxu1 }
 0x150   : > { %v1200_v47 = vadd.f32 %v2214_v40, %v743_v45  ;;  %v1232_v48 = vadd.f32 %v2214_v40, %v871_v46  ;;  %v1641_v49 = vpop.f32.mrb[2].mxu0  ;;  %v1673_v50 = vpop.f32.mrb[2].mxu1 }
 0x151   : > { %v1266_v51 = vmax.f32 %v1202_v43, 0.0  ;;  %v1298_v52 = vmax.f32 %v1234_v44, 0.0  ;;  %v1203_v53 = vadd.f32 %v1641_v49, %v2214_v40  ;;  %v1235_v54 = vadd.f32 %v1673_v50, %v2214_v40  ;;  %v746_v55 = vpop.f32.mrb[3].mxu0  ;;  %v874_v56 = vpop.f32.mrb[3].mxu1 }
 0x152   : > { %v1264_v57 = vmax.f32 %v1200_v47, 0.0  ;;  %v1296_v58 = vmax.f32 %v1232_v48, 0.0  ;;  %v1201_v59 = vadd.f32 %v2214_v40, %v746_v55  ;;  %v1233_v60 = vadd.f32 %v2214_v40, %v874_v56 }
 0x153   : > { %1330 = vst [vmem:[%s2225_s10 + $0x10] sm:$0xff] %v1266_v51  ;;  %1362 = vst [vmem:[%s2225_s10 + $0x110] sm:$0xff] %v1298_v52  ;;  %v1267_v61 = vmax.f32 %v1203_v53, 0.0  ;;  %v1299_v62 = vmax.f32 %v1235_v54, 0.0 }
 0x154   : > { %1328 = vst [vmem:[%s2225_s10] sm:$0xff] %v1264_v57  ;;  %1360 = vst [vmem:[%s2225_s10 + $0x100] sm:$0xff] %v1296_v58  ;;  %v1265_v63 = vmax.f32 %v1201_v59, 0.0  ;;  %v1297_v0 = vmax.f32 %v1233_v60, 0.0 }
 0x155   : > { %1331 = vst [vmem:[%s2225_s10 + $0x18] sm:$0xff] %v1267_v61  ;;  %1363 = vst [vmem:[%s2225_s10 + $0x118] sm:$0xff] %v1299_v62 }
 0x156   : > { %1329 = vst [vmem:[%s2225_s10 + $0x8] sm:$0xff] %v1265_v63  ;;  %1361 = vst [vmem:[%s2225_s10 + $0x108] sm:$0xff] %v1297_v0  ;;  %v1644_v1 = vpop.f32.mrb[4].mxu0  ;;  %v1676_v2 = vpop.f32.mrb[4].mxu1 }
 0x157   : > { %v1206_v3 = vadd.f32 %v1644_v1, %v2214_v40  ;;  %v1238_v4 = vadd.f32 %v1676_v2, %v2214_v40  ;;  %v759_v5 = vpop.f32.mrb[5].mxu0  ;;  %v887_v6 = vpop.f32.mrb[5].mxu1 }
 0x158   : > { %v1204_v7 = vadd.f32 %v2214_v40, %v759_v5  ;;  %v1236_v8 = vadd.f32 %v2214_v40, %v887_v6  ;;  %v1645_v9 = vpop.f32.mrb[6].mxu0  ;;  %v1677_v10 = vpop.f32.mrb[6].mxu1 }
 0x159   : > { %v1270_v11 = vmax.f32 %v1206_v3, 0.0  ;;  %v1302_v12 = vmax.f32 %v1238_v4, 0.0  ;;  %v1207_v13 = vadd.f32 %v1645_v9, %v2214_v40  ;;  %v1239_v14 = vadd.f32 %v1677_v10, %v2214_v40  ;;  %v762_v15 = vpop.f32.mrb[7].mxu0  ;;  %v890_v16 = vpop.f32.mrb[7].mxu1 }
 0x15a   : > { %v1268_v17 = vmax.f32 %v1204_v7, 0.0  ;;  %v1300_v18 = vmax.f32 %v1236_v8, 0.0  ;;  %v1205_v19 = vadd.f32 %v2214_v40, %v762_v15  ;;  %v1237_v20 = vadd.f32 %v2214_v40, %v890_v16 }
 0x15b   : > { %1334 = vst [vmem:[%s2225_s10 + $0x30] sm:$0xff] %v1270_v11  ;;  %1366 = vst [vmem:[%s2225_s10 + $0x130] sm:$0xff] %v1302_v12  ;;  %v1271_v21 = vmax.f32 %v1207_v13, 0.0  ;;  %v1303_v22 = vmax.f32 %v1239_v14, 0.0 }
 0x15c   : > { %1332 = vst [vmem:[%s2225_s10 + $0x20] sm:$0xff] %v1268_v17  ;;  %1364 = vst [vmem:[%s2225_s10 + $0x120] sm:$0xff] %v1300_v18  ;;  %v1269_v23 = vmax.f32 %v1205_v19, 0.0  ;;  %v1301_v24 = vmax.f32 %v1237_v20, 0.0 }
 0x15d   : > { %1335 = vst [vmem:[%s2225_s10 + $0x38] sm:$0xff] %v1271_v21  ;;  %1367 = vst [vmem:[%s2225_s10 + $0x138] sm:$0xff] %v1303_v22 }
 0x15e   : > { %1333 = vst [vmem:[%s2225_s10 + $0x28] sm:$0xff] %v1269_v23  ;;  %1365 = vst [vmem:[%s2225_s10 + $0x128] sm:$0xff] %v1301_v24  ;;  %v1648_v25 = vpop.f32.mrb[8].mxu0  ;;  %v1680_v26 = vpop.f32.mrb[8].mxu1 }
 0x15f   : > { %v1210_v27 = vadd.f32 %v1648_v25, %v2214_v40  ;;  %v1242_v28 = vadd.f32 %v1680_v26, %v2214_v40  ;;  %v775_v29 = vpop.f32.mrb[9].mxu0  ;;  %v903_v30 = vpop.f32.mrb[9].mxu1 }
 0x160   : > { %v1208_v31 = vadd.f32 %v2214_v40, %v775_v29  ;;  %v1240_v32 = vadd.f32 %v2214_v40, %v903_v30  ;;  %v1649_v33 = vpop.f32.mrb[10].mxu0  ;;  %v1681_v34 = vpop.f32.mrb[10].mxu1 }
 0x161   : > { %v1274_v35 = vmax.f32 %v1210_v27, 0.0  ;;  %v1306_v36 = vmax.f32 %v1242_v28, 0.0  ;;  %v1211_v37 = vadd.f32 %v1649_v33, %v2214_v40  ;;  %v1243_v38 = vadd.f32 %v1681_v34, %v2214_v40  ;;  %v778_v39 = vpop.f32.mrb[11].mxu0  ;;  %v906_v41 = vpop.f32.mrb[11].mxu1 }
 0x162   : > { %v1272_v42 = vmax.f32 %v1208_v31, 0.0  ;;  %v1304_v43 = vmax.f32 %v1240_v32, 0.0  ;;  %v1209_v44 = vadd.f32 %v2214_v40, %v778_v39  ;;  %v1241_v45 = vadd.f32 %v2214_v40, %v906_v41 }
 0x163   : > { %1338 = vst [vmem:[%s2225_s10 + $0x50] sm:$0xff] %v1274_v35  ;;  %1370 = vst [vmem:[%s2225_s10 + $0x150] sm:$0xff] %v1306_v36  ;;  %v1275_v46 = vmax.f32 %v1211_v37, 0.0  ;;  %v1307_v47 = vmax.f32 %v1243_v38, 0.0 }
 0x164   : > { %1336 = vst [vmem:[%s2225_s10 + $0x40] sm:$0xff] %v1272_v42  ;;  %1368 = vst [vmem:[%s2225_s10 + $0x140] sm:$0xff] %v1304_v43  ;;  %v1273_v48 = vmax.f32 %v1209_v44, 0.0  ;;  %v1305_v49 = vmax.f32 %v1241_v45, 0.0 }
 0x165   : > { %1339 = vst [vmem:[%s2225_s10 + $0x58] sm:$0xff] %v1275_v46  ;;  %1371 = vst [vmem:[%s2225_s10 + $0x158] sm:$0xff] %v1307_v47 }
 0x166   : > { %1337 = vst [vmem:[%s2225_s10 + $0x48] sm:$0xff] %v1273_v48  ;;  %1369 = vst [vmem:[%s2225_s10 + $0x148] sm:$0xff] %v1305_v49  ;;  %v1652_v50 = vpop.f32.mrb[12].mxu0  ;;  %v1684_v51 = vpop.f32.mrb[12].mxu1 }
 0x167   : > { %v1214_v52 = vadd.f32 %v1652_v50, %v2214_v40  ;;  %v1246_v53 = vadd.f32 %v1684_v51, %v2214_v40  ;;  %v791_v54 = vpop.f32.mrb[13].mxu0  ;;  %v919_v55 = vpop.f32.mrb[13].mxu1 }
 0x168   : > { %v1212_v56 = vadd.f32 %v2214_v40, %v791_v54  ;;  %v1244_v57 = vadd.f32 %v2214_v40, %v919_v55  ;;  %v1653_v58 = vpop.f32.mrb[14].mxu0  ;;  %v1685_v59 = vpop.f32.mrb[14].mxu1 }
 0x169   : > { %v1278_v60 = vmax.f32 %v1214_v52, 0.0  ;;  %v1310_v61 = vmax.f32 %v1246_v53, 0.0  ;;  %v1215_v62 = vadd.f32 %v1653_v58, %v2214_v40  ;;  %v1247_v63 = vadd.f32 %v1685_v59, %v2214_v40  ;;  %v794_v0 = vpop.f32.mrb[15].mxu0  ;;  %v922_v1 = vpop.f32.mrb[15].mxu1 }
 0x16a   : > { %v1276_v2 = vmax.f32 %v1212_v56, 0.0  ;;  %v1308_v3 = vmax.f32 %v1244_v57, 0.0  ;;  %v1213_v4 = vadd.f32 %v2214_v40, %v794_v0  ;;  %v1245_v5 = vadd.f32 %v2214_v40, %v922_v1 }
 0x16b   : > { %1342 = vst [vmem:[%s2225_s10 + $0x70] sm:$0xff] %v1278_v60  ;;  %1374 = vst [vmem:[%s2225_s10 + $0x170] sm:$0xff] %v1310_v61  ;;  %v1279_v6 = vmax.f32 %v1215_v62, 0.0  ;;  %v1311_v7 = vmax.f32 %v1247_v63, 0.0 }
 0x16c   : > { %1340 = vst [vmem:[%s2225_s10 + $0x60] sm:$0xff] %v1276_v2  ;;  %1372 = vst [vmem:[%s2225_s10 + $0x160] sm:$0xff] %v1308_v3  ;;  %v1277_v8 = vmax.f32 %v1213_v4, 0.0  ;;  %v1309_v9 = vmax.f32 %v1245_v5, 0.0 }
 0x16d   : > { %1343 = vst [vmem:[%s2225_s10 + $0x78] sm:$0xff] %v1279_v6  ;;  %1375 = vst [vmem:[%s2225_s10 + $0x178] sm:$0xff] %v1311_v7 }
 0x16e   : > { %1341 = vst [vmem:[%s2225_s10 + $0x68] sm:$0xff] %v1277_v8  ;;  %1373 = vst [vmem:[%s2225_s10 + $0x168] sm:$0xff] %v1309_v9  ;;  %v1656_v10 = vpop.f32.mrb[16].mxu0  ;;  %v1688_v11 = vpop.f32.mrb[16].mxu1 }
 0x16f   : > { %v1218_v12 = vadd.f32 %v1656_v10, %v2214_v40  ;;  %v1250_v13 = vadd.f32 %v1688_v11, %v2214_v40  ;;  %v807_v14 = vpop.f32.mrb[17].mxu0  ;;  %v935_v15 = vpop.f32.mrb[17].mxu1 }
 0x170   : > { %v1216_v16 = vadd.f32 %v2214_v40, %v807_v14  ;;  %v1248_v17 = vadd.f32 %v2214_v40, %v935_v15  ;;  %v1657_v18 = vpop.f32.mrb[18].mxu0  ;;  %v1689_v19 = vpop.f32.mrb[18].mxu1 }
 0x171   : > { %v1282_v20 = vmax.f32 %v1218_v12, 0.0  ;;  %v1314_v21 = vmax.f32 %v1250_v13, 0.0  ;;  %v1219_v22 = vadd.f32 %v1657_v18, %v2214_v40  ;;  %v1251_v23 = vadd.f32 %v1689_v19, %v2214_v40  ;;  %v810_v24 = vpop.f32.mrb[19].mxu0  ;;  %v938_v25 = vpop.f32.mrb[19].mxu1 }
 0x172   : > { %v1280_v26 = vmax.f32 %v1216_v16, 0.0  ;;  %v1312_v27 = vmax.f32 %v1248_v17, 0.0  ;;  %v1217_v28 = vadd.f32 %v2214_v40, %v810_v24  ;;  %v1249_v29 = vadd.f32 %v2214_v40, %v938_v25 }
 0x173   : > { %1346 = vst [vmem:[%s2225_s10 + $0x90] sm:$0xff] %v1282_v20  ;;  %1378 = vst [vmem:[%s2225_s10 + $0x190] sm:$0xff] %v1314_v21  ;;  %v1283_v30 = vmax.f32 %v1219_v22, 0.0  ;;  %v1315_v31 = vmax.f32 %v1251_v23, 0.0 }
 0x174   : > { %1344 = vst [vmem:[%s2225_s10 + $0x80] sm:$0xff] %v1280_v26  ;;  %1376 = vst [vmem:[%s2225_s10 + $0x180] sm:$0xff] %v1312_v27  ;;  %v1281_v32 = vmax.f32 %v1217_v28, 0.0  ;;  %v1313_v33 = vmax.f32 %v1249_v29, 0.0 }
 0x175   : > { %1347 = vst [vmem:[%s2225_s10 + $0x98] sm:$0xff] %v1283_v30  ;;  %1379 = vst [vmem:[%s2225_s10 + $0x198] sm:$0xff] %v1315_v31 }
 0x176   : > { %1345 = vst [vmem:[%s2225_s10 + $0x88] sm:$0xff] %v1281_v32  ;;  %1377 = vst [vmem:[%s2225_s10 + $0x188] sm:$0xff] %v1313_v33  ;;  %v1660_v34 = vpop.f32.mrb[20].mxu0  ;;  %v1692_v35 = vpop.f32.mrb[20].mxu1 }
 0x177   : > { %v1222_v36 = vadd.f32 %v1660_v34, %v2214_v40  ;;  %v1254_v37 = vadd.f32 %v1692_v35, %v2214_v40  ;;  %v823_v38 = vpop.f32.mrb[21].mxu0  ;;  %v951_v39 = vpop.f32.mrb[21].mxu1 }
 0x178   : > { %v1220_v41 = vadd.f32 %v2214_v40, %v823_v38  ;;  %v1252_v42 = vadd.f32 %v2214_v40, %v951_v39  ;;  %v1661_v43 = vpop.f32.mrb[22].mxu0  ;;  %v1693_v44 = vpop.f32.mrb[22].mxu1 }
 0x179   : > { %v1286_v45 = vmax.f32 %v1222_v36, 0.0  ;;  %v1318_v46 = vmax.f32 %v1254_v37, 0.0  ;;  %v1223_v47 = vadd.f32 %v1661_v43, %v2214_v40  ;;  %v1255_v48 = vadd.f32 %v1693_v44, %v2214_v40  ;;  %v826_v49 = vpop.f32.mrb[23].mxu0  ;;  %v954_v50 = vpop.f32.mrb[23].mxu1 }
 0x17a   : > { %v1284_v51 = vmax.f32 %v1220_v41, 0.0  ;;  %v1316_v52 = vmax.f32 %v1252_v42, 0.0  ;;  %v1221_v53 = vadd.f32 %v2214_v40, %v826_v49  ;;  %v1253_v54 = vadd.f32 %v2214_v40, %v954_v50 }
 0x17b   : > { %1350 = vst [vmem:[%s2225_s10 + $0xb0] sm:$0xff] %v1286_v45  ;;  %1382 = vst [vmem:[%s2225_s10 + $0x1b0] sm:$0xff] %v1318_v46  ;;  %v1287_v55 = vmax.f32 %v1223_v47, 0.0  ;;  %v1319_v56 = vmax.f32 %v1255_v48, 0.0 }
 0x17c   : > { %1348 = vst [vmem:[%s2225_s10 + $0xa0] sm:$0xff] %v1284_v51  ;;  %1380 = vst [vmem:[%s2225_s10 + $0x1a0] sm:$0xff] %v1316_v52  ;;  %v1285_v57 = vmax.f32 %v1221_v53, 0.0  ;;  %v1317_v58 = vmax.f32 %v1253_v54, 0.0 }
 0x17d   : > { %1351 = vst [vmem:[%s2225_s10 + $0xb8] sm:$0xff] %v1287_v55  ;;  %1383 = vst [vmem:[%s2225_s10 + $0x1b8] sm:$0xff] %v1319_v56 }
 0x17e   : > { %1349 = vst [vmem:[%s2225_s10 + $0xa8] sm:$0xff] %v1285_v57  ;;  %1381 = vst [vmem:[%s2225_s10 + $0x1a8] sm:$0xff] %v1317_v58  ;;  %v1664_v59 = vpop.f32.mrb[24].mxu0  ;;  %v1696_v60 = vpop.f32.mrb[24].mxu1 }
 0x17f   : > { %v1226_v61 = vadd.f32 %v1664_v59, %v2214_v40  ;;  %v1258_v62 = vadd.f32 %v1696_v60, %v2214_v40  ;;  %v839_v63 = vpop.f32.mrb[25].mxu0  ;;  %v967_v0 = vpop.f32.mrb[25].mxu1 }
 0x180   : > { %v1224_v1 = vadd.f32 %v2214_v40, %v839_v63  ;;  %v1256_v2 = vadd.f32 %v2214_v40, %v967_v0  ;;  %v1665_v3 = vpop.f32.mrb[26].mxu0  ;;  %v1697_v4 = vpop.f32.mrb[26].mxu1 }
 0x181   : > { %v1290_v5 = vmax.f32 %v1226_v61, 0.0  ;;  %v1322_v6 = vmax.f32 %v1258_v62, 0.0  ;;  %v1227_v7 = vadd.f32 %v1665_v3, %v2214_v40  ;;  %v1259_v8 = vadd.f32 %v1697_v4, %v2214_v40  ;;  %v842_v9 = vpop.f32.mrb[27].mxu0  ;;  %v970_v10 = vpop.f32.mrb[27].mxu1 }
 0x182   : > { %v1288_v11 = vmax.f32 %v1224_v1, 0.0  ;;  %v1320_v12 = vmax.f32 %v1256_v2, 0.0  ;;  %v1225_v13 = vadd.f32 %v2214_v40, %v842_v9  ;;  %v1257_v14 = vadd.f32 %v2214_v40, %v970_v10 }
 0x183   : > { %1354 = vst [vmem:[%s2225_s10 + $0xd0] sm:$0xff] %v1290_v5  ;;  %1386 = vst [vmem:[%s2225_s10 + $0x1d0] sm:$0xff] %v1322_v6  ;;  %v1291_v15 = vmax.f32 %v1227_v7, 0.0  ;;  %v1323_v16 = vmax.f32 %v1259_v8, 0.0 }
 0x184   : > { %1352 = vst [vmem:[%s2225_s10 + $0xc0] sm:$0xff] %v1288_v11  ;;  %1384 = vst [vmem:[%s2225_s10 + $0x1c0] sm:$0xff] %v1320_v12  ;;  %v1289_v17 = vmax.f32 %v1225_v13, 0.0  ;;  %v1321_v18 = vmax.f32 %v1257_v14, 0.0 }
 0x185   : > { %1355 = vst [vmem:[%s2225_s10 + $0xd8] sm:$0xff] %v1291_v15  ;;  %1387 = vst [vmem:[%s2225_s10 + $0x1d8] sm:$0xff] %v1323_v16 }
 0x186   : > { %1353 = vst [vmem:[%s2225_s10 + $0xc8] sm:$0xff] %v1289_v17  ;;  %1385 = vst [vmem:[%s2225_s10 + $0x1c8] sm:$0xff] %v1321_v18  ;;  %v1668_v19 = vpop.f32.mrb[28].mxu0  ;;  %v1700_v20 = vpop.f32.mrb[28].mxu1 }
 0x187   : > { %v1230_v21 = vadd.f32 %v1668_v19, %v2214_v40  ;;  %v1262_v22 = vadd.f32 %v1700_v20, %v2214_v40  ;;  %v855_v23 = vpop.f32.mrb[29].mxu0  ;;  %v983_v24 = vpop.f32.mrb[29].mxu1 }
 0x188   : > { %v1228_v25 = vadd.f32 %v2214_v40, %v855_v23  ;;  %v1260_v26 = vadd.f32 %v2214_v40, %v983_v24  ;;  %v1669_v27 = vpop.f32.mrb[30].mxu0  ;;  %v1701_v28 = vpop.f32.mrb[30].mxu1 }
 0x189   : > { %v1294_v29 = vmax.f32 %v1230_v21, 0.0  ;;  %v1326_v30 = vmax.f32 %v1262_v22, 0.0  ;;  %v1231_v31 = vadd.f32 %v1669_v27, %v2214_v40  ;;  %v1263_v32 = vadd.f32 %v1701_v28, %v2214_v40  ;;  %v858_v33 = vpop.f32.mrb[31].mxu0  ;;  %v986_v34 = vpop.f32.mrb[31].mxu1 }
 0x18a   : > { %v1292_v35 = vmax.f32 %v1228_v25, 0.0  ;;  %v1324_v36 = vmax.f32 %v1260_v26, 0.0  ;;  %v1229_v37 = vadd.f32 %v2214_v40, %v858_v33  ;;  %v1261_v38 = vadd.f32 %v2214_v40, %v986_v34 }
 0x18b   : > { %1358 = vst [vmem:[%s2225_s10 + $0xf0] sm:$0xff] %v1294_v29  ;;  %1390 = vst [vmem:[%s2225_s10 + $0x1f0] sm:$0xff] %v1326_v30  ;;  %v1295_v39 = vmax.f32 %v1231_v31, 0.0  ;;  %v1327_v41 = vmax.f32 %v1263_v32, 0.0 }
 0x18c   : > { %1356 = vst [vmem:[%s2225_s10 + $0xe0] sm:$0xff] %v1292_v35  ;;  %1388 = vst [vmem:[%s2225_s10 + $0x1e0] sm:$0xff] %v1324_v36  ;;  %v1293_v42 = vmax.f32 %v1229_v37, 0.0  ;;  %v1325_v43 = vmax.f32 %v1261_v38, 0.0 }
 0x18d   : > { %1359 = vst [vmem:[%s2225_s10 + $0xf8] sm:$0xff] %v1295_v39  ;;  %1391 = vst [vmem:[%s2225_s10 + $0x1f8] sm:$0xff] %v1327_v41 }
 0x18e   : > { %1357 = vst [vmem:[%s2225_s10 + $0xe8] sm:$0xff] %v1293_v42  ;;  %1389 = vst [vmem:[%s2225_s10 + $0x1e8] sm:$0xff] %v1325_v43 }
 0x18f   : > { %1906 = shalt.err (!%p1903_p5)
}
 0x190   : > { %s1907_s29 = scalar_lea.hbm %s2346_s19, 8192  ;;  %s1911_s20 = scalar_lea.hbm %s2405_s3, 32768 }
 0x191   : > { %p1908_p9 = scmp.ne.s32.totalorder %s2346_s19, %s1907_s29  ;;  %p1912_p3 = scmp.lt.u32.totalorder %s2346_s19, %s2405_s3 }
 0x192   : > { %p1913_p7 = scmp.lt.u32.totalorder %s1911_s20, %s1907_s29  ;;  %p1915_p4 = scmp.lt.u32.totalorder %s1907_s29, %s2346_s19 }
 0x193   : > { %p1909_p1 = pnand %p1908_p9, %p2106_p11 }
 0x194   : > { %p1914_p13 = por %p1913_p7, %p1912_p3 }
 0x195   : > { %p1910_p2 = pneg %p1909_p1 }
 0x196   : > { %p1916_p6 = por %p1915_p4, %p1914_p13 }
 0x198   : > { %p1917_p8 = pnand %p1916_p6, %p1910_p2 }
 0x19a   : > { %1920 = shalt.err (!%p1917_p8)
}
 0x19b   : > { %s1986_s10 = smov 128   ;;  %s1987_s11 = smov 8  }
 0x19c   : > { %1724 = dma.vmem_to_hbm [thread:$0]  (%p2106_p11), %s2348_s9, 8192, %s2346_s19, %s1393_s25, %s1986_s10, %s1986_s10, %s1987_s11  }
 0x19d PF: > { %p1741_p12 = scmp.ge.s32.totalorder %s1979_s17, 2  ;;  %s1422_s15 = sand.u32 1, %s1959_s12  }
 0x19e   : > { %p2423_p10 = scmp.ne.s32.totalorder %s2413_s23, 0  ;;  %s1423_s18 = scalar_lea.sflag [#allocation5], %s1422_s15 }
 0x1a0   : > { %p1735_p0 = pnand %p1741_p12, %p2423_p10 }
 0x1a2   : > { %1954 = dma.done.wait (!%p1735_p0), %s1423_s18, 8192  }
 0x1a3   : > { %1956 = vsyncadd (!%p1735_p0), %s1423_s18, 4294959104  ;;  %s20_s17 = sadd.s32 1, %s1979_s17   ;;  %s2424_s12 = smov %s1963_s13 }
 0x1a4   : > { %p17_p5 = scmp.ge.s32.totalorder %s20_s17, 6   ;;  %s2425_s13 = smov %s1967_s14 }
 0x1a5   : > { %s2426_s14 = smov %s2115_s5  ;;  %s2427_s15 = smov %s1975_s16 }
 0x1a6   : > { %s2428_s16 = smov %s2430_s28  ;;  %19 = sbr.rel (!%p17_p5) target bundleno = 7 (0x7), region = 93 }
 0x1ad   :  { %1428 = vsyncpa [#allocation4], 1 }
 0x1ae   :  { %1430 = vsyncpa [#allocation4 + $0x1], 1 }
 0x1af   :  { %1431 = vsyncpa [#allocation7], 1 }
 0x1b0   :  { %1432 = vsyncpa [#allocation5], 1 }
 0x1b1   :  { %1434 = vsyncpa [#allocation5 + $0x1], 1 }

</bundles_post_ra>
